<compile_context>
chip_gen: v5e
topology: v5e:2x2
jax: 0.10.0
libtpu: 0.0.40
codegen_flags: <defaults>
</compile_context>

<pallas_src>
import functools

import jax
import jax.numpy as jnp
import numpy as np
from jax import lax
from jax.experimental import pallas as pl
from jax.experimental.pallas import tpu as pltpu

EPS = 1e-5   # nn.BatchNorm2d default eps
R = 2        # image rows packed per lane-row  ->  lane dim = R*W*C = 128


def _basic_block_kernel(x_ref, bw1_ref, g1_ref, b1_ref,
                        bw2_ref, g2_ref, b2_ref, o_ref, *, H, W, C):
    """Fused conv3x3 -> BN -> ReLU -> conv3x3 -> BN -> +residual -> ReLU."""
    NH2, LANES = x_ref.shape            # (N*H/R, R*W*C)
    rows_per_img = H // R

    # Hoisted row-validity masks (shared by both convs): is the +-1 super-row
    # neighbour part of the same image?  They also kill pltpu.roll's circular
    # wrap at the batch edges.
    s_img = lax.broadcasted_iota(jnp.int32, (NH2, 1), 0) % rows_per_img
    m_up = s_img >= 1
    m_dn = s_img <= rows_per_img - 2

    count = jnp.float32(NH2 * R * W)    # elements per channel = N*H*W

    def conv3x3(y, bw_ref):
        # ky taps = +-1 super-row shifts (XLU roll, register resident);
        # kx taps + width zero-padding are folded into the banded weights.
        up = jnp.where(m_up, pltpu.roll(y, shift=1, axis=0), 0.0)
        dn = jnp.where(m_dn, pltpu.roll(y, shift=NH2 - 1, axis=0), 0.0)
        taps = jnp.concatenate([up, y, dn], axis=1)        # (NH2, 3*LANES) f32
        # One bf16 cast per stage, one big-K matmul per conv (K = 3*LANES).
        return jnp.dot(taps.astype(jnp.bfloat16), bw_ref[...],
                       preferred_element_type=jnp.float32)

    def lane_group_sum(v):
        # Per-channel sum, broadcast back to every lane of that channel.
        # Channels repeat every C lanes; a log2 rotate tree over lane strides
        # C, 2C, 4C, ... sums the full residue class (LANES/C is a power of 2).
        shift = C
        while shift < LANES:
            v = v + pltpu.roll(v, shift=shift, axis=1)
            shift *= 2
        return v

    def batchnorm(y, g_ref, b_ref):
        # Training-mode BatchNorm2d with two-pass (numerically safe) variance.
        mean = lane_group_sum(jnp.sum(y, axis=0, keepdims=True)) / count
        yc = y - mean
        var = lane_group_sum(jnp.sum(yc * yc, axis=0, keepdims=True)) / count
        scale = g_ref[...] * lax.rsqrt(var + EPS)          # per-lane, (1, LANES)
        return yc * scale + b_ref[...]
        # TODO(synk): running_mean/running_var bookkeeping is not modeled (it
        # does not affect the training-mode forward output).

    x = x_ref[...]
    # stage 1: conv1 -> bn1 -> relu
    out1 = jnp.maximum(batchnorm(conv3x3(x, bw1_ref), g1_ref, b1_ref), 0.0)
    # stage 2: conv2 -> bn2 -> +residual -> relu
    out2 = batchnorm(conv3x3(out1, bw2_ref), g2_ref, b2_ref)
    o_ref[...] = jnp.maximum(out2 + x, 0.0)


def _banded_conv_weights(w_hwio, W, rows):
    """Fold the 3x3 conv's kx taps, width zero-padding, and the within-super-row
    ky taps into one banded (3*rows*W*Cin, rows*W*Cout) matrix, so each conv is
    a SINGLE bf16 matmul over the concatenated [up | mid | dn] taps."""
    w_np = np.asarray(w_hwio, np.float32)               # (3, 3, Cin, Cout)
    KH, KW, Cin, Cout = w_np.shape
    lanes_in, lanes_out = rows * W * Cin, rows * W * Cout
    banded = np.zeros((3 * lanes_in, lanes_out), np.float32)
    for d in (-1, 0, 1):                                 # up / mid / dn super-row
        for r_in in range(rows):
            for r_out in range(rows):
                kh = rows * d + r_in - r_out + 1
                if not 0 <= kh < KH:
                    continue
                for w_out in range(W):
                    for kw in range(KW):
                        w_in = w_out + kw - 1
                        if not 0 <= w_in < W:
                            continue
                        ri = (d + 1) * lanes_in + (r_in * W + w_in) * Cin
                        ci = (r_out * W + w_out) * Cout
                        banded[ri:ri + Cin, ci:ci + Cout] = w_np[kh, kw]
    return jnp.asarray(banded, jnp.bfloat16)             # bf16 matmul operands


def basic_block_forward(x_nchw, params):
    N, C, H, W = x_nchw.shape
    assert H % R == 0, "row-pairing layout needs an even image height"
    LANES = R * W * C
    NH2 = (N * H) // R
    assert (LANES // C) & (LANES // C - 1) == 0, "lane-rotate BN needs LANES/C = 2^k"

    # NCHW -> NHWC -> (N*H/R, R*W*C): row-paired, 128-lane-dense layout.
    # TODO(synk): in a full network keep activations in this layout end-to-end
    # instead of paying the relayout around every block.
    x2d = jnp.transpose(x_nchw, (0, 2, 3, 1)).reshape(NH2, LANES).astype(jnp.float32)

    bw1 = _banded_conv_weights(params["w1"], W, R)       # (3*LANES, LANES) bf16
    bw2 = _banded_conv_weights(params["w2"], W, R)

    def tile_lanes(v):                                   # per-lane gamma / beta
        return jnp.tile(v.astype(jnp.float32), R * W).reshape(1, LANES)

    g1, b1 = tile_lanes(params["g1"]), tile_lanes(params["b1"])
    g2, b2 = tile_lanes(params["g2"]), tile_lanes(params["b2"])

    kernel = functools.partial(_basic_block_kernel, H=H, W=W, C=C)

    def full(shape):
        nd = len(shape)
        return pl.BlockSpec(shape, lambda i, _nd=nd: (0,) * _nd)

    # Explicit VMEM budget (scoped defaults are 16/32/32 MiB on v5e/v6e/v7x;
    # 64 MiB is the v7x physical cap -- trivially satisfied at this size).
    vmem_bytes = (2 * NH2 * LANES * 4          # x in + out (f32)
                  + 2 * int(bw1.size) * 2      # two banded conv weights (bf16)
                  + 4 * LANES * 4)             # tiled BN gammas / betas
    vmem_limit = int(min(2 * vmem_bytes + (8 << 20), 64 << 20))

    # NOTE: grid=(1,) keeps this tiny problem fully VMEM/register resident.
    # TODO(synk): for production sizes, tile N*H/R on a "parallel" grid axis
    # (uses both v7x TensorCores) plus a two-pass BN accumulator restructure --
    # naive per-tile BN silently changes semantics.
    out2d = pl.pallas_call(
        kernel,
        out_shape=jax.ShapeDtypeStruct((NH2, LANES), jnp.float32),
        grid=(1,),
        in_specs=[full((NH2, LANES)),
                  full((3 * LANES, LANES)), full((1, LANES)), full((1, LANES)),
                  full((3 * LANES, LANES)), full((1, LANES)), full((1, LANES))],
        out_specs=full((NH2, LANES)),
        compiler_params=pltpu.CompilerParams(
            dimension_semantics=("arbitrary",),
            vmem_limit_bytes=vmem_limit),
    )(x2d, bw1, g1, b1, bw2, g2, b2)

    return jnp.transpose(out2d.reshape(N, H, W, C), (0, 3, 1, 2))


def ref_forward(x, params):
    """Pure-JAX reference mirroring the PyTorch BasicBlock forward (train-mode BN)."""
    def conv(y, w_hwio):
        return lax.conv_general_dilated(y, w_hwio, (1, 1), ((1, 1), (1, 1)),
                                        dimension_numbers=("NCHW", "HWIO", "NCHW"))

    def bn(y, g, b):
        mean = jnp.mean(y, axis=(0, 2, 3), keepdims=True)
        var = jnp.mean((y - mean) ** 2, axis=(0, 2, 3), keepdims=True)
        return (g.reshape(1, -1, 1, 1) * (y - mean) / jnp.sqrt(var + EPS)
                + b.reshape(1, -1, 1, 1))

    out = jax.nn.relu(bn(conv(x, params["w1"]), params["g1"], params["b1"]))
    out = bn(conv(out, params["w2"]), params["g2"], params["b2"])
    return jax.nn.relu(out + x)


if __name__ == "__main__":
    N, C, H, W = 2, 4, 16, 16  # inplanes = planes = 4, stride = 1, downsample = None

    key = jax.random.PRNGKey(0)
    ks = jax.random.split(key, 7)
    x = jax.random.normal(ks[0], (N, C, H, W), jnp.float32)

    # Deterministic synthetic parameters (shapes from BasicBlock.__init__).
    params = {
        "w1": 0.2 * jax.random.normal(ks[1], (3, 3, C, C), jnp.float32),  # conv1, HWIO
        "w2": 0.2 * jax.random.normal(ks[2], (3, 3, C, C), jnp.float32),  # conv2, HWIO
        "g1": 1.0 + 0.1 * jax.random.normal(ks[3], (C,), jnp.float32),    # bn1 weight
        "b1": 0.1 * jax.random.normal(ks[4], (C,), jnp.float32),          # bn1 bias
        "g2": 1.0 + 0.1 * jax.random.normal(ks[5], (C,), jnp.float32),    # bn2 weight
        "b2": 0.1 * jax.random.normal(ks[6], (C,), jnp.float32),          # bn2 bias
    }

    out = basic_block_forward(x, params)
    jax.block_until_ready(out)

    ref = ref_forward(x, params)
    # bf16 matmul operands with f32 accumulation -> relaxed tolerance.
    np.testing.assert_allclose(np.asarray(out), np.asarray(ref), atol=2e-2, rtol=2e-2)

    print("KERNEL_OK")
</pallas_src>

<mosaic_0001>
module attributes {stable_mosaic.version = 11 : i64} {
  func.func @_basic_block_kernel(%arg0: i32, %arg1: memref<16x128xf32, #tpu.memory_space<vmem>>, %arg2: memref<384x128xbf16, #tpu.memory_space<vmem>>, %arg3: memref<1x128xf32, #tpu.memory_space<vmem>>, %arg4: memref<1x128xf32, #tpu.memory_space<vmem>>, %arg5: memref<384x128xbf16, #tpu.memory_space<vmem>>, %arg6: memref<1x128xf32, #tpu.memory_space<vmem>>, %arg7: memref<1x128xf32, #tpu.memory_space<vmem>>, %arg8: memref<16x128xf32, #tpu.memory_space<vmem>>) attributes {dimension_semantics = [#tpu.dimension_semantics<arbitrary>], iteration_bounds = array<i64: 1>, scalar_prefetch = 0 : i64, scratch_operands = 0 : i64, tpu.core_type = #tpu.core_type<tc>, window_params = [{pipeline_mode = #tpu.pipeline_mode<synchronous>, transform_indices = @transform_0, window_bounds = array<i64: 16, 128>}, {pipeline_mode = #tpu.pipeline_mode<synchronous>, transform_indices = @transform_1, window_bounds = array<i64: 384, 128>}, {pipeline_mode = #tpu.pipeline_mode<synchronous>, transform_indices = @transform_2, window_bounds = array<i64: 1, 128>}, {pipeline_mode = #tpu.pipeline_mode<synchronous>, transform_indices = @transform_3, window_bounds = array<i64: 1, 128>}, {pipeline_mode = #tpu.pipeline_mode<synchronous>, transform_indices = @transform_4, window_bounds = array<i64: 384, 128>}, {pipeline_mode = #tpu.pipeline_mode<synchronous>, transform_indices = @transform_5, window_bounds = array<i64: 1, 128>}, {pipeline_mode = #tpu.pipeline_mode<synchronous>, transform_indices = @transform_6, window_bounds = array<i64: 1, 128>}, {pipeline_mode = #tpu.pipeline_mode<synchronous>, transform_indices = @transform_7, window_bounds = array<i64: 16, 128>}]} {
    %0 = tpu.iota {dimensions = array<i32: 0>} : vector<16x1xi32>
    %c8_i32 = arith.constant 8 : i32
    %c0_i32 = arith.constant 0 : i32
    %1 = arith.cmpi eq, %c8_i32, %c0_i32 : i32
    %c1_i32 = arith.constant 1 : i32
    %2 = arith.select %1, %c1_i32, %c8_i32 : i32
    %3 = vector.broadcast %2 : i32 to vector<16x1xi32>
    %4 = arith.remsi %0, %3 : vector<16x1xi32>
    %c0_i32_0 = arith.constant 0 : i32
    %5 = vector.broadcast %c0_i32_0 : i32 to vector<16x1xi32>
    %6 = arith.cmpi ne, %4, %5 : vector<16x1xi32>
    %c0_i32_1 = arith.constant 0 : i32
    %7 = vector.broadcast %c0_i32_1 : i32 to vector<16x1xi32>
    %8 = arith.cmpi slt, %4, %7 : vector<16x1xi32>
    %c0_i32_2 = arith.constant 0 : i32
    %9 = arith.cmpi slt, %2, %c0_i32_2 : i32
    %10 = vector.broadcast %9 : i1 to vector<16x1xi1>
    %11 = vector.broadcast %10 : vector<16x1xi1> to vector<16x1xi1>
    %12 = arith.xori %8, %11 : vector<16x1xi1>
    %13 = arith.andi %12, %6 : vector<16x1xi1>
    %14 = vector.broadcast %2 : i32 to vector<16x1xi32>
    %15 = arith.addi %4, %14 : vector<16x1xi32>
    %16 = arith.select %13, %15, %4 : vector<16x1xi1>, vector<16x1xi32>
    %c1_i32_3 = arith.constant 1 : i32
    %17 = vector.broadcast %c1_i32_3 : i32 to vector<16x1xi32>
    %18 = arith.cmpi sge, %16, %17 : vector<16x1xi32>
    %c6_i32 = arith.constant 6 : i32
    %19 = vector.broadcast %c6_i32 : i32 to vector<16x1xi32>
    %20 = arith.cmpi sle, %16, %19 : vector<16x1xi32>
    %c0 = arith.constant 0 : index
    %c0_4 = arith.constant 0 : index
    %21 = vector.load %arg1[%c0, %c0_4] : memref<16x128xf32, #tpu.memory_space<vmem>>, vector<16x128xf32>
    %c1_i32_5 = arith.constant 1 : i32
    %22 = tpu.dynamic_rotate %21 by %c1_i32_5 dim 0 : vector<16x128xf32>, i32 -> vector<16x128xf32>
    %cst = arith.constant 0.000000e+00 : f32
    %23 = vector.shape_cast %18 : vector<16x1xi1> to vector<16x1xi1>
    %24 = vector.broadcast %23 : vector<16x1xi1> to vector<16x128xi1>
    %25 = vector.broadcast %cst : f32 to vector<16x128xf32>
    %26 = arith.select %24, %22, %25 : vector<16x128xi1>, vector<16x128xf32>
    %c15_i32 = arith.constant 15 : i32
    %27 = tpu.dynamic_rotate %21 by %c15_i32 dim 0 : vector<16x128xf32>, i32 -> vector<16x128xf32>
    %cst_6 = arith.constant 0.000000e+00 : f32
    %28 = vector.shape_cast %20 : vector<16x1xi1> to vector<16x1xi1>
    %29 = vector.broadcast %28 : vector<16x1xi1> to vector<16x128xi1>
    %30 = vector.broadcast %cst_6 : f32 to vector<16x128xf32>
    %31 = arith.select %29, %27, %30 : vector<16x128xi1>, vector<16x128xf32>
    %32 = tpu.concatenate %26, %21, %31 in 1 : vector<16x128xf32>, vector<16x128xf32>, vector<16x128xf32> -> vector<16x384xf32>
    %33 = arith.truncf %32 : vector<16x384xf32> to vector<16x384xbf16>
    %c0_7 = arith.constant 0 : index
    %c0_8 = arith.constant 0 : index
    %34 = vector.load %arg2[%c0_7, %c0_8] : memref<384x128xbf16, #tpu.memory_space<vmem>>, vector<384x128xbf16>
    %cst_9 = arith.constant dense<0.000000e+00> : vector<16x128xf32>
    %35 = tpu.matmul %33, %34, %cst_9 {dimension_numbers = #tpu.dot_dimension_numbers<[1], [0], [0], [1], [0, 0, 1, 1], [], []>} : vector<16x384xbf16>, vector<384x128xbf16>, vector<16x128xf32> -> vector<16x128xf32>
    %cst_10 = arith.constant dense<0.000000e+00> : vector<128xf32>
    %36 = vector.multi_reduction <add>, %35, %cst_10 [0] : vector<16x128xf32> to vector<128xf32>
    %37 = vector.shape_cast %36 : vector<128xf32> to vector<1x128xf32>
    %c4_i32 = arith.constant 4 : i32
    %38 = tpu.dynamic_rotate %37 by %c4_i32 dim 1 : vector<1x128xf32>, i32 -> vector<1x128xf32>
    %39 = arith.addf %37, %38 : vector<1x128xf32>
    %c8_i32_11 = arith.constant 8 : i32
    %40 = tpu.dynamic_rotate %39 by %c8_i32_11 dim 1 : vector<1x128xf32>, i32 -> vector<1x128xf32>
    %41 = arith.addf %39, %40 : vector<1x128xf32>
    %c16_i32 = arith.constant 16 : i32
    %42 = tpu.dynamic_rotate %41 by %c16_i32 dim 1 : vector<1x128xf32>, i32 -> vector<1x128xf32>
    %43 = arith.addf %41, %42 : vector<1x128xf32>
    %c32_i32 = arith.constant 32 : i32
    %44 = tpu.dynamic_rotate %43 by %c32_i32 dim 1 : vector<1x128xf32>, i32 -> vector<1x128xf32>
    %45 = arith.addf %43, %44 : vector<1x128xf32>
    %c64_i32 = arith.constant 64 : i32
    %46 = tpu.dynamic_rotate %45 by %c64_i32 dim 1 : vector<1x128xf32>, i32 -> vector<1x128xf32>
    %47 = arith.addf %45, %46 : vector<1x128xf32>
    %cst_12 = arith.constant 5.120000e+02 : f32
    %48 = vector.broadcast %cst_12 : f32 to vector<1x128xf32>
    %49 = arith.divf %47, %48 : vector<1x128xf32>
    %50 = vector.broadcast %49 : vector<1x128xf32> to vector<16x128xf32>
    %51 = arith.subf %35, %50 : vector<16x128xf32>
    %52 = arith.mulf %51, %51 : vector<16x128xf32>
    %cst_13 = arith.constant dense<0.000000e+00> : vector<128xf32>
    %53 = vector.multi_reduction <add>, %52, %cst_13 [0] : vector<16x128xf32> to vector<128xf32>
    %54 = vector.shape_cast %53 : vector<128xf32> to vector<1x128xf32>
    %c4_i32_14 = arith.constant 4 : i32
    %55 = tpu.dynamic_rotate %54 by %c4_i32_14 dim 1 : vector<1x128xf32>, i32 -> vector<1x128xf32>
    %56 = arith.addf %54, %55 : vector<1x128xf32>
    %c8_i32_15 = arith.constant 8 : i32
    %57 = tpu.dynamic_rotate %56 by %c8_i32_15 dim 1 : vector<1x128xf32>, i32 -> vector<1x128xf32>
    %58 = arith.addf %56, %57 : vector<1x128xf32>
    %c16_i32_16 = arith.constant 16 : i32
    %59 = tpu.dynamic_rotate %58 by %c16_i32_16 dim 1 : vector<1x128xf32>, i32 -> vector<1x128xf32>
    %60 = arith.addf %58, %59 : vector<1x128xf32>
    %c32_i32_17 = arith.constant 32 : i32
    %61 = tpu.dynamic_rotate %60 by %c32_i32_17 dim 1 : vector<1x128xf32>, i32 -> vector<1x128xf32>
    %62 = arith.addf %60, %61 : vector<1x128xf32>
    %c64_i32_18 = arith.constant 64 : i32
    %63 = tpu.dynamic_rotate %62 by %c64_i32_18 dim 1 : vector<1x128xf32>, i32 -> vector<1x128xf32>
    %64 = arith.addf %62, %63 : vector<1x128xf32>
    %cst_19 = arith.constant 5.120000e+02 : f32
    %65 = vector.broadcast %cst_19 : f32 to vector<1x128xf32>
    %66 = arith.divf %64, %65 : vector<1x128xf32>
    %c0_20 = arith.constant 0 : index
    %c0_21 = arith.constant 0 : index
    %67 = vector.load %arg3[%c0_20, %c0_21] : memref<1x128xf32, #tpu.memory_space<vmem>>, vector<1x128xf32>
    %cst_22 = arith.constant 9.99999974E-6 : f32
    %68 = vector.broadcast %cst_22 : f32 to vector<1x128xf32>
    %69 = arith.addf %66, %68 : vector<1x128xf32>
    %70 = math.rsqrt %69 : vector<1x128xf32>
    %71 = arith.mulf %67, %70 : vector<1x128xf32>
    %72 = vector.broadcast %71 : vector<1x128xf32> to vector<16x128xf32>
    %73 = arith.mulf %51, %72 : vector<16x128xf32>
    %c0_23 = arith.constant 0 : index
    %c0_24 = arith.constant 0 : index
    %74 = vector.load %arg4[%c0_23, %c0_24] : memref<1x128xf32, #tpu.memory_space<vmem>>, vector<1x128xf32>
    %75 = vector.broadcast %74 : vector<1x128xf32> to vector<16x128xf32>
    %76 = arith.addf %73, %75 : vector<16x128xf32>
    %cst_25 = arith.constant 0.000000e+00 : f32
    %77 = vector.broadcast %cst_25 : f32 to vector<16x128xf32>
    %78 = arith.maximumf %76, %77 : vector<16x128xf32>
    %c1_i32_26 = arith.constant 1 : i32
    %79 = tpu.dynamic_rotate %78 by %c1_i32_26 dim 0 : vector<16x128xf32>, i32 -> vector<16x128xf32>
    %cst_27 = arith.constant 0.000000e+00 : f32
    %80 = vector.shape_cast %18 : vector<16x1xi1> to vector<16x1xi1>
    %81 = vector.broadcast %80 : vector<16x1xi1> to vector<16x128xi1>
    %82 = vector.broadcast %cst_27 : f32 to vector<16x128xf32>
    %83 = arith.select %81, %79, %82 : vector<16x128xi1>, vector<16x128xf32>
    %c15_i32_28 = arith.constant 15 : i32
    %84 = tpu.dynamic_rotate %78 by %c15_i32_28 dim 0 : vector<16x128xf32>, i32 -> vector<16x128xf32>
    %cst_29 = arith.constant 0.000000e+00 : f32
    %85 = vector.shape_cast %20 : vector<16x1xi1> to vector<16x1xi1>
    %86 = vector.broadcast %85 : vector<16x1xi1> to vector<16x128xi1>
    %87 = vector.broadcast %cst_29 : f32 to vector<16x128xf32>
    %88 = arith.select %86, %84, %87 : vector<16x128xi1>, vector<16x128xf32>
    %89 = tpu.concatenate %83, %78, %88 in 1 : vector<16x128xf32>, vector<16x128xf32>, vector<16x128xf32> -> vector<16x384xf32>
    %90 = arith.truncf %89 : vector<16x384xf32> to vector<16x384xbf16>
    %c0_30 = arith.constant 0 : index
    %c0_31 = arith.constant 0 : index
    %91 = vector.load %arg5[%c0_30, %c0_31] : memref<384x128xbf16, #tpu.memory_space<vmem>>, vector<384x128xbf16>
    %cst_32 = arith.constant dense<0.000000e+00> : vector<16x128xf32>
    %92 = tpu.matmul %90, %91, %cst_32 {dimension_numbers = #tpu.dot_dimension_numbers<[1], [0], [0], [1], [0, 0, 1, 1], [], []>} : vector<16x384xbf16>, vector<384x128xbf16>, vector<16x128xf32> -> vector<16x128xf32>
    %cst_33 = arith.constant dense<0.000000e+00> : vector<128xf32>
    %93 = vector.multi_reduction <add>, %92, %cst_33 [0] : vector<16x128xf32> to vector<128xf32>
    %94 = vector.shape_cast %93 : vector<128xf32> to vector<1x128xf32>
    %c4_i32_34 = arith.constant 4 : i32
    %95 = tpu.dynamic_rotate %94 by %c4_i32_34 dim 1 : vector<1x128xf32>, i32 -> vector<1x128xf32>
    %96 = arith.addf %94, %95 : vector<1x128xf32>
    %c8_i32_35 = arith.constant 8 : i32
    %97 = tpu.dynamic_rotate %96 by %c8_i32_35 dim 1 : vector<1x128xf32>, i32 -> vector<1x128xf32>
    %98 = arith.addf %96, %97 : vector<1x128xf32>
    %c16_i32_36 = arith.constant 16 : i32
    %99 = tpu.dynamic_rotate %98 by %c16_i32_36 dim 1 : vector<1x128xf32>, i32 -> vector<1x128xf32>
    %100 = arith.addf %98, %99 : vector<1x128xf32>
    %c32_i32_37 = arith.constant 32 : i32
    %101 = tpu.dynamic_rotate %100 by %c32_i32_37 dim 1 : vector<1x128xf32>, i32 -> vector<1x128xf32>
    %102 = arith.addf %100, %101 : vector<1x128xf32>
    %c64_i32_38 = arith.constant 64 : i32
    %103 = tpu.dynamic_rotate %102 by %c64_i32_38 dim 1 : vector<1x128xf32>, i32 -> vector<1x128xf32>
    %104 = arith.addf %102, %103 : vector<1x128xf32>
    %cst_39 = arith.constant 5.120000e+02 : f32
    %105 = vector.broadcast %cst_39 : f32 to vector<1x128xf32>
    %106 = arith.divf %104, %105 : vector<1x128xf32>
    %107 = vector.broadcast %106 : vector<1x128xf32> to vector<16x128xf32>
    %108 = arith.subf %92, %107 : vector<16x128xf32>
    %109 = arith.mulf %108, %108 : vector<16x128xf32>
    %cst_40 = arith.constant dense<0.000000e+00> : vector<128xf32>
    %110 = vector.multi_reduction <add>, %109, %cst_40 [0] : vector<16x128xf32> to vector<128xf32>
    %111 = vector.shape_cast %110 : vector<128xf32> to vector<1x128xf32>
    %c4_i32_41 = arith.constant 4 : i32
    %112 = tpu.dynamic_rotate %111 by %c4_i32_41 dim 1 : vector<1x128xf32>, i32 -> vector<1x128xf32>
    %113 = arith.addf %111, %112 : vector<1x128xf32>
    %c8_i32_42 = arith.constant 8 : i32
    %114 = tpu.dynamic_rotate %113 by %c8_i32_42 dim 1 : vector<1x128xf32>, i32 -> vector<1x128xf32>
    %115 = arith.addf %113, %114 : vector<1x128xf32>
    %c16_i32_43 = arith.constant 16 : i32
    %116 = tpu.dynamic_rotate %115 by %c16_i32_43 dim 1 : vector<1x128xf32>, i32 -> vector<1x128xf32>
    %117 = arith.addf %115, %116 : vector<1x128xf32>
    %c32_i32_44 = arith.constant 32 : i32
    %118 = tpu.dynamic_rotate %117 by %c32_i32_44 dim 1 : vector<1x128xf32>, i32 -> vector<1x128xf32>
    %119 = arith.addf %117, %118 : vector<1x128xf32>
    %c64_i32_45 = arith.constant 64 : i32
    %120 = tpu.dynamic_rotate %119 by %c64_i32_45 dim 1 : vector<1x128xf32>, i32 -> vector<1x128xf32>
    %121 = arith.addf %119, %120 : vector<1x128xf32>
    %cst_46 = arith.constant 5.120000e+02 : f32
    %122 = vector.broadcast %cst_46 : f32 to vector<1x128xf32>
    %123 = arith.divf %121, %122 : vector<1x128xf32>
    %c0_47 = arith.constant 0 : index
    %c0_48 = arith.constant 0 : index
    %124 = vector.load %arg6[%c0_47, %c0_48] : memref<1x128xf32, #tpu.memory_space<vmem>>, vector<1x128xf32>
    %cst_49 = arith.constant 9.99999974E-6 : f32
    %125 = vector.broadcast %cst_49 : f32 to vector<1x128xf32>
    %126 = arith.addf %123, %125 : vector<1x128xf32>
    %127 = math.rsqrt %126 : vector<1x128xf32>
    %128 = arith.mulf %124, %127 : vector<1x128xf32>
    %129 = vector.broadcast %128 : vector<1x128xf32> to vector<16x128xf32>
    %130 = arith.mulf %108, %129 : vector<16x128xf32>
    %c0_50 = arith.constant 0 : index
    %c0_51 = arith.constant 0 : index
    %131 = vector.load %arg7[%c0_50, %c0_51] : memref<1x128xf32, #tpu.memory_space<vmem>>, vector<1x128xf32>
    %132 = vector.broadcast %131 : vector<1x128xf32> to vector<16x128xf32>
    %133 = arith.addf %130, %132 : vector<16x128xf32>
    %134 = arith.addf %133, %21 : vector<16x128xf32>
    %cst_52 = arith.constant 0.000000e+00 : f32
    %135 = vector.broadcast %cst_52 : f32 to vector<16x128xf32>
    %136 = arith.maximumf %134, %135 : vector<16x128xf32>
    %c0_53 = arith.constant 0 : index
    %c0_54 = arith.constant 0 : index
    %137 = vector.load %arg8[%c0_53, %c0_54] : memref<16x128xf32, #tpu.memory_space<vmem>>, vector<16x128xf32>
    tpu.vector_store %arg8[%c0_53, %c0_54], %136 {strides = array<i32>} : memref<16x128xf32, #tpu.memory_space<vmem>>, vector<16x128xf32>,
    return
  }
  func.func @transform_0(%arg0: i32) -> (i32, i32) {
    %c0_i32 = arith.constant 0 : i32
    %c0_i32_0 = arith.constant 0 : i32
    %c0_i32_1 = arith.constant 0 : i32
    return %c0_i32, %c0_i32_0 : i32, i32
  }
  func.func @transform_1(%arg0: i32) -> (i32, i32) {
    %c0_i32 = arith.constant 0 : i32
    %c0_i32_0 = arith.constant 0 : i32
    %c0_i32_1 = arith.constant 0 : i32
    return %c0_i32, %c0_i32_0 : i32, i32
  }
  func.func @transform_2(%arg0: i32) -> (i32, i32) {
    %c0_i32 = arith.constant 0 : i32
    %c0_i32_0 = arith.constant 0 : i32
    %c0_i32_1 = arith.constant 0 : i32
    return %c0_i32, %c0_i32_0 : i32, i32
  }
  func.func @transform_3(%arg0: i32) -> (i32, i32) {
    %c0_i32 = arith.constant 0 : i32
    %c0_i32_0 = arith.constant 0 : i32
    %c0_i32_1 = arith.constant 0 : i32
    return %c0_i32, %c0_i32_0 : i32, i32
  }
  func.func @transform_4(%arg0: i32) -> (i32, i32) {
    %c0_i32 = arith.constant 0 : i32
    %c0_i32_0 = arith.constant 0 : i32
    %c0_i32_1 = arith.constant 0 : i32
    return %c0_i32, %c0_i32_0 : i32, i32
  }
  func.func @transform_5(%arg0: i32) -> (i32, i32) {
    %c0_i32 = arith.constant 0 : i32
    %c0_i32_0 = arith.constant 0 : i32
    %c0_i32_1 = arith.constant 0 : i32
    return %c0_i32, %c0_i32_0 : i32, i32
  }
  func.func @transform_6(%arg0: i32) -> (i32, i32) {
    %c0_i32 = arith.constant 0 : i32
    %c0_i32_0 = arith.constant 0 : i32
    %c0_i32_1 = arith.constant 0 : i32
    return %c0_i32, %c0_i32_0 : i32, i32
  }
  func.func @transform_7(%arg0: i32) -> (i32, i32) {
    %c0_i32 = arith.constant 0 : i32
    %c0_i32_0 = arith.constant 0 : i32
    %c0_i32_1 = arith.constant 0 : i32
    return %c0_i32, %c0_i32_0 : i32, i32
  }
}

</mosaic_0001>

<bundles_post_ra>
// kernel: tpu_custom_call.1
= control target key start
LH: loop header
LB: loop body
LE: loop exit
PB: predicated region body
PF: predicated region fallthrough
CT: control target
= control target key end

     0   :  { %12 = vsyncpa [#allocation3], 0  ;;  %s1374_s0 = inlined_call_operand.hbm [shape: f32[16,128], index: 0, kind: input, shape index: {}]   ;;  %s1375_s1 = inlined_call_operand.hbm [shape: bf16[384,128], index: 1, kind: input, shape index: {}]   ;;  %s1376_s2 = inlined_call_operand.vmem [shape: f32[1,128], index: 2, kind: input, shape index: {}]   ;;  %s1377_s3 = inlined_call_operand.vmem [shape: f32[1,128], index: 3, kind: input, shape index: {}]   ;;  %s1378_s4 = inlined_call_operand.hbm [shape: bf16[384,128], index: 4, kind: input, shape index: {}]   ;;  %s1379_s5 = inlined_call_operand.vmem [shape: f32[1,128], index: 5, kind: input, shape index: {}]   ;;  %s1380_s6 = inlined_call_operand.vmem [shape: f32[1,128], index: 6, kind: input, shape index: {}]   ;;  %s1381_s7 = inlined_call_operand.hbm [shape: f32[16,128], index: 7, kind: output, shape index: {}]  }
   0x1   :  { %13 = vsyncpa [#allocation6], 0  ;;  %s32_s26 = sshll.u32 %s1375_s1, 4  ;;  %s33_s26 = int_to_ptr.hbm [resolvable:$true] %s32_s26 }
   0x2   :  { %14 = vsyncpa [#allocation4], 0  ;;  %s1173_s27 = smov [#allocation5]   ;;  %s19_s8 = sshll.u32 %s1374_s0, 4  ;;  %s20_s8 = int_to_ptr.hbm [resolvable:$true] %s19_s8 }
   0x3   :  { %s34_s28 = sshll.u32 %s1173_s27, 4  ;;  %s1174_s9 = smov 64   ;;  %s35_s28 = int_to_ptr.vmem [resolvable:$true] %s34_s28 }
   0x4   :  { %s1175_s10 = smov 4   ;;  %s1176_s11 = smov [#allocation2]  }
   0x5   :  { %40 = dma.hbm_to_vmem [thread:$0]  %s33_s26, 3072, %s35_s28, [#allocation6], %s1174_s9, %s1174_s9, %s1175_s10  }
   0x6   :  { %s21_s12 = sshll.u32 %s1176_s11, 4  ;;  %s1177_s1 = smov 128   ;;  %s22_s12 = int_to_ptr.vmem [resolvable:$true] %s21_s12 }
   0x7   :  { %s1178_s13 = smov 8   ;;  %s49_s0 = sshll.u32 %s1378_s4, 4  ;;  %s50_s0 = int_to_ptr.hbm [resolvable:$true] %s49_s0 }
   0x8   :  { %27 = dma.hbm_to_vmem [thread:$0]  %s20_s8, 256, %s22_s12, [#allocation3], %s1177_s1, %s1177_s1, %s1178_s13  }
   0x9   :  { %s1179_s16 = smov [#allocation7]  }
   0xa   :  { %s51_s17 = sshll.u32 %s1179_s16, 4  ;;  %s52_s17 = int_to_ptr.vmem [resolvable:$true] %s51_s17 }
   0xb   :  { %57 = dma.hbm_to_vmem [thread:$0]  %s50_s0, 3072, %s52_s17, [#allocation6], %s1174_s9, %s1174_s9, %s1175_s10  }
   0xc   :  { %1167 = dma.done.wait [#allocation3], 256  }
   0xd   :  { %1168 = vsyncadd [#allocation3], 4294967040 }
   0xe   :  { %1169 = dma.done.wait [#allocation6], 6144  }
   0xf   :  { %1170 = vsyncadd [#allocation6], 4294961152  ;;  %v1011_v0 = vld [vmem:[#allocation5 + $0x38] sm:$0xff]  ;;  %v1010_v3 = vld [vmem:[#allocation5 + $0x30] sm:$0xff]  ;;  %v74_v12 = vlaneseq  ;;  %s1180_s4 = smov 16   ;;  %s1181_s18 = smov 32  }
  0x10   :  { %v1019_v1 = vld [vmem:[#allocation5 + $0x78] sm:$0xff]  ;;  %324 = vmatpush.bf16.msra.mxu0 %v1011_v0  ;;  %v1018_v4 = vld [vmem:[#allocation5 + $0x70] sm:$0xff]  ;;  %v1009_v6 = vld [vmem:[#allocation5 + $0x28] sm:$0xff]  ;;  %s1183_s25 = smov [#allocation8]   ;;  %s786_s28 = sshll.u32 %s1381_s7, 4  ;;  %s787_s28 = int_to_ptr.hbm [resolvable:$true] %s786_s28 }
  0x11   :  { %v1027_v2 = vld [vmem:[#allocation5 + $0xb8] sm:$0xff]  ;;  %338 = vmatpush.bf16.msra.mxu1 %v1019_v1  ;;  %v1026_v5 = vld [vmem:[#allocation5 + $0xb0] sm:$0xff]  ;;  %v1017_v7 = vld [vmem:[#allocation5 + $0x68] sm:$0xff]  ;;  %v1242_v16 = vshrl.u32 %v74_v12, 7 }
  0x12   :  { %352 = vmatpush.bf16.msra.mxu2 %v1027_v2  ;;  %v1025_v8 = vld [vmem:[#allocation5 + $0xa8] sm:$0xff]  ;;  %v1008_v9 = vld [vmem:[#allocation5 + $0x20] sm:$0xff]  ;;  %v1007_v13 = vld [vmem:[#allocation5 + $0x18] sm:$0xff] }
  0x13   :  { %v1016_v10 = vld [vmem:[#allocation5 + $0x60] sm:$0xff]  ;;  %v1015_v14 = vld [vmem:[#allocation5 + $0x58] sm:$0xff]  ;;  %v1006_v17 = vld [vmem:[#allocation5 + $0x10] sm:$0xff]  ;;  %v76_v20 = vadd.s32 8, %v1242_v16  ;;  %v81_v25 = vand.u32 7, %v1242_v16  ;;  %vm109_vm0 = vcmp.lt.s32.totalorder %v1242_v16, 1 }
  0x14   :  { %325 = vmatpush.bf16.msra.mxu0 %v1010_v3  ;;  %v1024_v11 = vld [vmem:[#allocation5 + $0xa0] sm:$0xff]  ;;  %v1023_v15 = vld [vmem:[#allocation5 + $0x98] sm:$0xff]  ;;  %v1014_v18 = vld [vmem:[#allocation5 + $0x50] sm:$0xff]  ;;  %vm120_vm1 = vcmp.lt.s32.totalorder %v1242_v16, 7 }
  0x15   :  { %339 = vmatpush.bf16.msra.mxu1 %v1018_v4  ;;  %v1022_v19 = vld [vmem:[#allocation5 + $0x90] sm:$0xff]  ;;  %v1247_v22 = vld [vmem:[#allocation2 + $0x8] sm:$0xff]  ;;  %v1005_v23 = vld [vmem:[#allocation5 + $0x8] sm:$0xff]  ;;  %v88_v29 = vand.u32 7, %v76_v20  ;;  %vm1260_vm2 = vcmp.ge.s32.totalorder %v81_v25, 1  ;;  %vm1272_vm4 = vcmp.le.s32.totalorder %v81_v25, 6 }
  0x16   :  { %353 = vmatpush.bf16.msra.mxu2 %v1026_v5  ;;  %v1245_v21 = vld [vmem:[#allocation2] sm:$0xff]  ;;  %v1013_v24 = vld [vmem:[#allocation5 + $0x48] sm:$0xff]  ;;  %v108_v27 = vrot.slane %v1247_v22, 7  ;;  %v119_v31 = vrot.slane %v1247_v22, 1  ;;  %v1004_v32 = vld [vmem:[#allocation5] sm:$0xff] }
  0x17   :  { %v107_v26 = vrot.slane %v1245_v21, 7  ;;  %v1021_v28 = vld [vmem:[#allocation5 + $0x88] sm:$0xff]  ;;  %v118_v30 = vrot.slane %v1245_v21, 1  ;;  %v1012_v33 = vld [vmem:[#allocation5 + $0x40] sm:$0xff]  ;;  %vm1264_vm3 = vcmp.ge.s32.totalorder %v88_v29, 1  ;;  %vm1276_vm5 = vcmp.le.s32.totalorder %v88_v29, 6 }
  0x18   :  { %326 = vmatpush.bf16.msra.mxu0 %v1009_v6  ;;  %v1020_v36 = vld [vmem:[#allocation5 + $0x80] sm:$0xff]  ;;  %v130_v44 = vpack.c.bf16 %v1247_v22, %v1245_v21  ;;  %vm896_vm6 = vmpackc.low %vm1264_vm3, %vm1260_vm2 }
  0x19   :  { %340 = vmatpush.bf16.msra.mxu1 %v1017_v7  ;;  %v110_v34 = vsel %vm109_vm0, %v107_v26, %v108_v27  ;;  %v111_v35 = vsel %vm109_vm0, %v108_v27, %v107_v26  ;;  %v121_v39 = vsel %vm120_vm1, %v118_v30, %v119_v31  ;;  %v122_v40 = vsel %vm120_vm1, %v119_v31, %v118_v30  ;;  %vm899_vm7 = vmpackc.low %vm1276_vm5, %vm1272_vm4 }
  0x1a   :  { %354 = vmatpush.bf16.msra.mxu2 %v1025_v8  ;;  %v897_v43 = vpack.c.bf16 %v110_v34, %v111_v35  ;;  %v900_v45 = vpack.c.bf16 %v122_v40, %v121_v39  ;;  %v1182_v7 = vmov 512.0  }
  0x1b   :  { %1065 = vrcp.f32 %v1182_v7 }
  0x1c   :  { %327 = vmatpush.bf16.msra.mxu0 %v1008_v9 }
  0x1d   :  { %341 = vmatpush.bf16.msra.mxu1 %v1016_v10 }
  0x1e   :  { %355 = vmatpush.bf16.msra.mxu2 %v1024_v11 }
  0x20   :  { %328 = vmatpush.bf16.msra.mxu0 %v1007_v13 }
  0x21   :  { %342 = vmatpush.bf16.msra.mxu1 %v1015_v14  ;;  %v1066_v8 = vpop.eup %1065 }
  0x22   :  { %356 = vmatpush.bf16.msra.mxu2 %v1023_v15  ;;  %v389_v9 = vmul.f32 512.0, %v1066_v8  ;;  %vm393_vm8 = vweird.f32 %v1066_v8 }
  0x24   :  { %329 = vmatpush.bf16.msra.mxu0 %v1006_v17  ;;  %v390_v10 = vsub.f32 1.0, %v389_v9 }
  0x25   :  { %343 = vmatpush.bf16.msra.mxu1 %v1014_v18 }
  0x26   :  { %357 = vmatpush.bf16.msra.mxu2 %v1022_v19  ;;  %v391_v11 = vmul.f32 %v1066_v8, %v390_v10 }
  0x28   :  { %330 = vmatpush.bf16.msra.mxu0 %v1005_v23  ;;  %v392_v12 = vadd.f32 %v1066_v8, %v391_v11 }
  0x29   :  { %344 = vmatpush.bf16.msra.mxu1 %v1013_v24 }
  0x2a   :  { %358 = vmatpush.bf16.msra.mxu2 %v1021_v28  ;;  %v1305_v13 = vsel %vm393_vm8, %v1066_v8, %v392_v12 }
  0x2c   :  { %331 = vmatpush.bf16.msra.mxu0 %v1004_v32 }
  0x2d   :  { %345 = vmatpush.bf16.msra.mxu1 %v1012_v33 }
  0x2e   :  { %359 = vmatpush.bf16.msra.mxu2 %v1020_v36 }
  0x2f   :  { %898 = vmatmul.msk.bf16.vlgmr.msra.gmra.mxu0 %vm896_vm6, %v897_v43 }
  0x30   :  { %346 = vmatmul.bf16.vlgmr.msra.gmra.mxu1 %v130_v44  ;;  %v1043_v44 = vld [vmem:[#allocation7 + $0x78] sm:$0xff] }
  0x31   :  { %901 = vmatmul.msk.bf16.vlgmr.msra.gmra.mxu2 %vm899_vm7, %v900_v45  ;;  %671 = vmatpush.bf16.msrb.mxu0 %v1043_v44  ;;  %v1035_v45 = vld [vmem:[#allocation7 + $0x38] sm:$0xff] }
  0x32   :  { %657 = vmatpush.bf16.msra.mxu3 %v1035_v45 }
  0xac   :  { %v333_v46 = vpop.f32.mrf.mxu0 }
  0xad   :  { %v347_v47 = vpop.f32.mrf.mxu1 }
  0xae   :  { %v348_v51 = vadd.f32 %v347_v47, %v333_v46  ;;  %v1051_v46 = vld [vmem:[#allocation7 + $0xb8] sm:$0xff]  ;;  %v1042_v47 = vld [vmem:[#allocation7 + $0x70] sm:$0xff] }
  0xaf   :  { %685 = vmatpush.bf16.msrb.mxu1 %v1051_v46  ;;  %672 = vmatpush.bf16.msrb.mxu0 %v1042_v47 }
  0xb4   :  { %v361_v48 = vpop.f32.mrf.mxu2  ;;  %v335_v49 = vpop.f32.mrf.mxu0 }
  0xb5   :  { %v349_v50 = vpop.f32.mrf.mxu1  ;;  %v362_v54 = vadd.f32 %v361_v48, %v348_v51  ;;  %v1034_v48 = vld [vmem:[#allocation7 + $0x30] sm:$0xff]  ;;  %v1033_v51 = vld [vmem:[#allocation7 + $0x28] sm:$0xff] }
  0xb6   :  { %v350_v52 = vadd.f32 %v349_v50, %v335_v49  ;;  %v1050_v49 = vld [vmem:[#allocation7 + $0xb0] sm:$0xff]  ;;  %v1041_v50 = vld [vmem:[#allocation7 + $0x68] sm:$0xff]  ;;  %658 = vmatpush.bf16.msra.mxu3 %v1034_v48 }
  0xb7   :  { %686 = vmatpush.bf16.msrb.mxu1 %v1050_v49  ;;  %673 = vmatpush.bf16.msrb.mxu0 %v1041_v50 }
  0xba   :  { %659 = vmatpush.bf16.msra.mxu3 %v1033_v51 }
  0xbc   :  { %v363_v53 = vpop.f32.mrf.mxu2 }
  0xbd   :  { %v364_v55 = vadd.f32 %v363_v53, %v350_v52  ;;  %v1049_v52 = vld [vmem:[#allocation7 + $0xa8] sm:$0xff]  ;;  %v1040_v53 = vld [vmem:[#allocation7 + $0x60] sm:$0xff] }
  0xbe   :  { %687 = vmatpush.bf16.msrb.mxu1 %v1049_v52  ;;  %674 = vmatpush.bf16.msrb.mxu0 %v1040_v53 }
  0xbf   :  { %v366_v56 = vadd.f32 %v364_v55, %v362_v54 }
  0xc1   :  { %v367_v57 = vrot.slane %v366_v56, 4 }
  0xc3   :  { %v368_v58 = vadd.f32 %v367_v57, %v366_v56  ;;  %v1039_v56 = vld [vmem:[#allocation7 + $0x58] sm:$0xff] }
  0xc4   :  { %675 = vmatpush.bf16.msrb.mxu0 %v1039_v56  ;;  %v1031_v57 = vld [vmem:[#allocation7 + $0x18] sm:$0xff] }
  0xc5   :  { %v369_v59 = vrot.slane %v368_v58, 2 }
  0xc7   :  { %v370_v60 = vadd.f32 %v369_v59, %v368_v58  ;;  %v1047_v58 = vld [vmem:[#allocation7 + $0x98] sm:$0xff]  ;;  %v1038_v59 = vld [vmem:[#allocation7 + $0x50] sm:$0xff] }
  0xc8   :  { %676 = vmatpush.bf16.msrb.mxu0 %v1038_v59 }
  0xc9   :  { %v371_v61 = vrot.slane %v370_v60, 1 }
  0xcb   :  { %v372_v62 = vadd.f32 %v371_v61, %v370_v60  ;;  %v1030_v60 = vld [vmem:[#allocation7 + $0x10] sm:$0xff] }
  0xcc   :  { %v1046_v61 = vld [vmem:[#allocation7 + $0x90] sm:$0xff] }
  0xcd   :  { %373 = vrot.lane.b32.xlu0 %v372_v62, %s1175_s10 }
 0x13f   :  { %v374_v63 = vpop.permute.xlu0 %373 }
 0x140   :  { %v375_v0 = vadd.f32 %v374_v63, %v372_v62  ;;  %v1037_v62 = vld [vmem:[#allocation7 + $0x48] sm:$0xff] }
 0x141   :  { %v1029_v63 = vld [vmem:[#allocation7 + $0x8] sm:$0xff]  ;;  %677 = vmatpush.bf16.msrb.mxu0 %v1037_v62 }
 0x142   :  { %376 = vrot.lane.b32.xlu0 %v375_v0, %s1178_s13 }
 0x1b4   :  { %v377_v1 = vpop.permute.xlu0 %376 }
 0x1b5   :  { %v378_v2 = vadd.f32 %v377_v1, %v375_v0  ;;  %v1045_v0 = vld [vmem:[#allocation7 + $0x88] sm:$0xff]  ;;  %v1036_v1 = vld [vmem:[#allocation7 + $0x40] sm:$0xff] }
 0x1b6   :  { %678 = vmatpush.bf16.msrb.mxu0 %v1036_v1 }
 0x1b7   :  { %379 = vrot.lane.b32.xlu1 %v378_v2, %s1180_s4 }
 0x229   :  { %v380_v3 = vpop.permute.xlu1 %379 }
 0x22a   :  { %v381_v4 = vadd.f32 %v380_v3, %v378_v2 }
 0x22c   :  { %382 = vrot.lane.b32.xlu1 %v381_v4, %s1181_s18 }
 0x29e   :  { %v383_v5 = vpop.permute.xlu1 %382 }
 0x29f   :  { %v384_v6 = vadd.f32 %v383_v5, %v381_v4  ;;  %v1028_v4 = vld [vmem:[#allocation7] sm:$0xff] }
 0x2a1   :  { %385 = vrot.lane.b32.xlu2 %v384_v6, %s1174_s9 }
 0x2fb   :  { %v386_v14 = vpop.permute.xlu2 %385 }
 0x2fc   :  { %v387_v15 = vadd.f32 %v386_v14, %v384_v6  ;;  %v1044_v6 = vld [vmem:[#allocation7 + $0x80] sm:$0xff]  ;;  %v424_v14 = vld [vmem:[%s1376_s2] sm:$0x1] }
 0x2fe   :  { %v395_v17 = vmul.f32 %v1305_v13, %v387_v15 }
 0x300   :  { %v396_v18 = vperm.slane %v395_v17, 0 }
 0x302   :  { %v1308_v19 = vsub.f32 %v362_v54, %v396_v18  ;;  %v1310_v20 = vsub.f32 %v364_v55, %v396_v18  ;;  %v1032_v54 = vld [vmem:[#allocation7 + $0x20] sm:$0xff] }
 0x303   :  { %v1048_v55 = vld [vmem:[#allocation7 + $0xa0] sm:$0xff]  ;;  %660 = vmatpush.bf16.msra.mxu3 %v1032_v54 }
 0x304   :  { %v399_v23 = vmul.f32 %v1308_v19, %v1308_v19  ;;  %v400_v24 = vmul.f32 %v1310_v20, %v1310_v20  ;;  %688 = vmatpush.bf16.msrb.mxu1 %v1048_v55 }
 0x306   :  { %v401_v25 = vadd.f32 %v400_v24, %v399_v23  ;;  %v1063_v24 = vld [vmem:[%s1377_s3] ss:$0 sm:$0xff] }
 0x307   :  { %661 = vmatpush.bf16.msra.mxu3 %v1031_v57 }
 0x308   :  { %v402_v26 = vrot.slane %v401_v25, 4  ;;  %689 = vmatpush.bf16.msrb.mxu1 %v1047_v58 }
 0x30a   :  { %v403_v27 = vadd.f32 %v402_v26, %v401_v25 }
 0x30b   :  { %662 = vmatpush.bf16.msra.mxu3 %v1030_v60 }
 0x30c   :  { %v404_v28 = vrot.slane %v403_v27, 2  ;;  %690 = vmatpush.bf16.msrb.mxu1 %v1046_v61 }
 0x30e   :  { %v405_v29 = vadd.f32 %v404_v28, %v403_v27 }
 0x30f   :  { %663 = vmatpush.bf16.msra.mxu3 %v1029_v63 }
 0x310   :  { %v406_v30 = vrot.slane %v405_v29, 1  ;;  %691 = vmatpush.bf16.msrb.mxu1 %v1045_v0 }
 0x312   :  { %v407_v31 = vadd.f32 %v406_v30, %v405_v29 }
 0x313   :  { %664 = vmatpush.bf16.msra.mxu3 %v1028_v4 }
 0x314   :  { %408 = vrot.lane.b32.xlu2 %v407_v31, %s1175_s10  ;;  %692 = vmatpush.bf16.msrb.mxu1 %v1044_v6 }
 0x36e   :  { %v409_v32 = vpop.permute.xlu2 %408 }
 0x36f   :  { %v410_v33 = vadd.f32 %v409_v32, %v407_v31 }
 0x371   :  { %411 = vrot.lane.b32.xlu0 %v410_v33, %s1178_s13 }
 0x3e3   :  { %v412_v34 = vpop.permute.xlu0 %411 }
 0x3e4   :  { %v413_v35 = vadd.f32 %v412_v34, %v410_v33 }
 0x3e6   :  { %414 = vrot.lane.b32.xlu1 %v413_v35, %s1180_s4 }
 0x458   :  { %v415_v36 = vpop.permute.xlu1 %414 }
 0x459   :  { %v416_v39 = vadd.f32 %v415_v36, %v413_v35 }
 0x45b   :  { %417 = vrot.lane.b32.xlu2 %v416_v39, %s1181_s18 }
 0x4b5   :  { %v418_v40 = vpop.permute.xlu2 %417 }
 0x4b6   :  { %v419_v43 = vadd.f32 %v418_v40, %v416_v39 }
 0x4b8   :  { %420 = vrot.lane.b32.xlu0 %v419_v43, %s1174_s9 }
 0x52a   :  { %v421_v2 = vpop.permute.xlu0 %420 }
 0x52b   :  { %v422_v3 = vadd.f32 %v421_v2, %v419_v43 }
 0x52d   :  { %v423_v5 = vmul.f32 %v422_v3, %v1305_v13 }
 0x52f   :  { %v425_v7 = vadd.f32 1e-05, %v423_v5 }
 0x531   :  { %1067 = vrsqrt.f32 %v425_v7  ;;  %vm432_vm10 = vweird.f32 %v425_v7 }
 0x537   :  { %v1068_v8 = vpop.eup %1067 }
 0x538   :  { %v427_v9 = vmul.f32 %v1068_v8, %v425_v7  ;;  %vm433_vm9 = vweird.f32 %v1068_v8 }
 0x539   :  { %vm434_vm11 = vmor %vm432_vm10, %vm433_vm9 }
 0x53a   :  { %v428_v10 = vmul.f32 %v1068_v8, %v427_v9 }
 0x53c   :  { %v429_v11 = vmul.f32 0.5, %v428_v10 }
 0x53e   :  { %v430_v12 = vsub.f32 1.5, %v429_v11 }
 0x540   :  { %v431_v15 = vmul.f32 %v1068_v8, %v430_v12 }
 0x542   :  { %v435_v17 = vsel %vm434_vm11, %v1068_v8, %v431_v15 }
 0x543   :  { %v436_v18 = vmul.f32 %v435_v17, %v424_v14 }
 0x545   :  { %v438_v23 = vperm.slane %v436_v18, 0 }
 0x547   :  { %v440_v25 = vmul.f32 %v438_v23, %v1308_v19  ;;  %v441_v26 = vmul.f32 %v438_v23, %v1310_v20 }
 0x549   :  { %v446_v27 = vadd.f32 %v1063_v24, %v440_v25  ;;  %v447_v28 = vadd.f32 %v1063_v24, %v441_v26 }
 0x54b   :  { %v448_v29 = vmax.f32 %v446_v27, 0.0  ;;  %v449_v30 = vmax.f32 %v447_v28, 0.0 }
 0x54d   :  { %v463_v31 = vpack.c.bf16 %v449_v30, %v448_v29  ;;  %v450_v32 = vrot.slane %v448_v29, 7  ;;  %v451_v33 = vrot.slane %v449_v30, 7  ;;  %v456_v34 = vrot.slane %v448_v29, 1 }
 0x54e   :  { %v457_v35 = vrot.slane %v449_v30, 1 }
 0x54f   :  { %679 = vmatmul.bf16.vlgmr.msrb.gmra.mxu0 %v463_v31  ;;  %v452_v36 = vsel %vm109_vm0, %v450_v32, %v451_v33  ;;  %v453_v39 = vsel %vm109_vm0, %v451_v33, %v450_v32 }
 0x550   :  { %v999_v40 = vpack.c.bf16 %v452_v36, %v453_v39  ;;  %v458_v19 = vsel %vm120_vm1, %v456_v34, %v457_v35  ;;  %v459_v20 = vsel %vm120_vm1, %v457_v35, %v456_v34 }
 0x551   :  { %v1002_v43 = vpack.c.bf16 %v459_v20, %v458_v19 }
 0x552   :  { %1000 = vmatmul.msk.bf16.vlgmr.msra.gmra.mxu3 %vm896_vm6, %v999_v40  ;;  %v750_v40 = vld [vmem:[%s1379_s5] sm:$0x1]  ;;  %s784_s5 = sshll.u32 %s1183_s25, 4  ;;  %s785_s5 = int_to_ptr.vmem [resolvable:$true] %s784_s5 }
 0x553   :  { %1003 = vmatmul.msk.bf16.vlgmr.msrb.gmra.mxu1 %vm899_vm7, %v1002_v43 }
 0x5cc   :  { %v680_v44 = vpop.f32.mrf.mxu0 }
 0x5d0   :  { %v694_v45 = vpop.f32.mrf.mxu1 }
 0x5d4   :  { %v682_v48 = vpop.f32.mrf.mxu0 }
 0x5d5   :  { %v666_v46 = vpop.f32.mrf.mxu3 }
 0x5d6   :  { %v681_v47 = vadd.f32 %v680_v44, %v666_v46 }
 0x5d8   :  { %v696_v50 = vpop.f32.mrf.mxu1  ;;  %v695_v51 = vadd.f32 %v694_v45, %v681_v47 }
 0x5dd   :  { %v668_v16 = vpop.f32.mrf.mxu3 }
 0x5de   :  { %v683_v49 = vadd.f32 %v682_v48, %v668_v16 }
 0x5e0   :  { %v697_v38 = vadd.f32 %v696_v50, %v683_v49 }
 0x5e2   :  { %v699_v52 = vadd.f32 %v697_v38, %v695_v51 }
 0x5e4   :  { %v700_v37 = vrot.slane %v699_v52, 4 }
 0x5e6   :  { %v701_v53 = vadd.f32 %v700_v37, %v699_v52 }
 0x5e8   :  { %v702_v54 = vrot.slane %v701_v53, 2 }
 0x5ea   :  { %v703_v55 = vadd.f32 %v702_v54, %v701_v53 }
 0x5ec   :  { %v704_v42 = vrot.slane %v703_v55, 1 }
 0x5ee   :  { %v705_v56 = vadd.f32 %v704_v42, %v703_v55 }
 0x5f0   :  { %706 = vrot.lane.b32.xlu1 %v705_v56, %s1175_s10 }
 0x662   :  { %v707_v41 = vpop.permute.xlu1 %706 }
 0x663   :  { %v708_v57 = vadd.f32 %v707_v41, %v705_v56 }
 0x665   :  { %709 = vrot.lane.b32.xlu2 %v708_v57, %s1178_s13 }
 0x6bf   :  { %v710_v58 = vpop.permute.xlu2 %709 }
 0x6c0   :  { %v711_v59 = vadd.f32 %v710_v58, %v708_v57 }
 0x6c2   :  { %712 = vrot.lane.b32.xlu0 %v711_v59, %s1180_s4 }
 0x734   :  { %v713_v60 = vpop.permute.xlu0 %712 }
 0x735   :  { %v714_v61 = vadd.f32 %v713_v60, %v711_v59 }
 0x737   :  { %715 = vrot.lane.b32.xlu1 %v714_v61, %s1181_s18 }
 0x7a9   :  { %v716_v62 = vpop.permute.xlu1 %715 }
 0x7aa   :  { %v717_v63 = vadd.f32 %v716_v62, %v714_v61 }
 0x7ac   :  { %718 = vrot.lane.b32.xlu2 %v717_v63, %s1174_s9 }
 0x806   :  { %v719_v0 = vpop.permute.xlu2 %718 }
 0x807   :  { %v720_v1 = vadd.f32 %v719_v0, %v717_v63 }
 0x809   :  { %v721_v2 = vmul.f32 %v720_v1, %v1305_v13 }
 0x80b   :  { %v722_v3 = vperm.slane %v721_v2, 0 }
 0x80d   :  { %v723_v4 = vsub.f32 %v695_v51, %v722_v3  ;;  %v724_v5 = vsub.f32 %v697_v38, %v722_v3 }
 0x80f   :  { %v725_v6 = vmul.f32 %v723_v4, %v723_v4  ;;  %v726_v7 = vmul.f32 %v724_v5, %v724_v5 }
 0x811   :  { %v727_v8 = vadd.f32 %v726_v7, %v725_v6 }
 0x813   :  { %v728_v9 = vrot.slane %v727_v8, 4 }
 0x815   :  { %v729_v10 = vadd.f32 %v728_v9, %v727_v8 }
 0x817   :  { %v730_v11 = vrot.slane %v729_v10, 2 }
 0x819   :  { %v731_v12 = vadd.f32 %v730_v11, %v729_v10 }
 0x81b   :  { %v732_v14 = vrot.slane %v731_v12, 1 }
 0x81d   :  { %v733_v15 = vadd.f32 %v732_v14, %v731_v12 }
 0x81f   :  { %734 = vrot.lane.b32.xlu0 %v733_v15, %s1175_s10 }
 0x891   :  { %v735_v17 = vpop.permute.xlu0 %734 }
 0x892   :  { %v736_v18 = vadd.f32 %v735_v17, %v733_v15 }
 0x894   :  { %737 = vrot.lane.b32.xlu1 %v736_v18, %s1178_s13 }
 0x906   :  { %v738_v23 = vpop.permute.xlu1 %737 }
 0x907   :  { %v739_v24 = vadd.f32 %v738_v23, %v736_v18 }
 0x909   :  { %740 = vrot.lane.b32.xlu2 %v739_v24, %s1180_s4 }
 0x963   :  { %v741_v25 = vpop.permute.xlu2 %740 }
 0x964   :  { %v742_v26 = vadd.f32 %v741_v25, %v739_v24 }
 0x966   :  { %743 = vrot.lane.b32.xlu0 %v742_v26, %s1181_s18 }
 0x9d8   :  { %v744_v27 = vpop.permute.xlu0 %743 }
 0x9d9   :  { %v745_v28 = vadd.f32 %v744_v27, %v742_v26 }
 0x9db   :  { %746 = vrot.lane.b32.xlu1 %v745_v28, %s1174_s9 }
 0xa4d   :  { %v747_v29 = vpop.permute.xlu1 %746 }
 0xa4e   :  { %v748_v30 = vadd.f32 %v747_v29, %v745_v28 }
 0xa50   :  { %v749_v31 = vmul.f32 %v748_v30, %v1305_v13  ;;  %v1064_v13 = vld [vmem:[%s1380_s6] ss:$0 sm:$0xff] }
 0xa52   :  { %v751_v32 = vadd.f32 1e-05, %v749_v31 }
 0xa54   :  { %1069 = vrsqrt.f32 %v751_v32  ;;  %vm758_vm13 = vweird.f32 %v751_v32 }
 0xa5a   :  { %v1070_v33 = vpop.eup %1069 }
 0xa5b   :  { %v753_v34 = vmul.f32 %v1070_v33, %v751_v32  ;;  %vm759_vm12 = vweird.f32 %v1070_v33 }
 0xa5c   :  { %vm760_vm14 = vmor %vm758_vm13, %vm759_vm12 }
 0xa5d   :  { %v754_v35 = vmul.f32 %v1070_v33, %v753_v34 }
 0xa5f   :  { %v755_v36 = vmul.f32 0.5, %v754_v35 }
 0xa61   :  { %v756_v39 = vsub.f32 1.5, %v755_v36 }
 0xa63   :  { %v757_v19 = vmul.f32 %v1070_v33, %v756_v39 }
 0xa65   :  { %v761_v20 = vsel %vm760_vm14, %v1070_v33, %v757_v19 }
 0xa66   :  { %v762_v43 = vmul.f32 %v761_v20, %v750_v40 }
 0xa68   :  { %v764_v44 = vperm.slane %v762_v43, 0 }
 0xa6a   :  { %v766_v45 = vmul.f32 %v764_v44, %v723_v4  ;;  %v767_v46 = vmul.f32 %v764_v44, %v724_v5 }
 0xa6c   :  { %v772_v47 = vadd.f32 %v1064_v13, %v766_v45  ;;  %v773_v48 = vadd.f32 %v1064_v13, %v767_v46 }
 0xa6e   :  { %v774_v16 = vadd.f32 %v772_v47, %v1245_v21  ;;  %v775_v49 = vadd.f32 %v773_v48, %v1247_v22 }
 0xa70   :  { %v776_v50 = vmax.f32 %v774_v16, 0.0  ;;  %v777_v51 = vmax.f32 %v775_v49, 0.0 }
 0xa72   :  { %778 = vst [vmem:[#allocation8] sm:$0xff] %v776_v50 }
 0xa73   :  { %779 = vst [vmem:[#allocation8 + $0x8] sm:$0xff] %v777_v51 }
 0xa74   :  { %792 = dma.vmem_to_hbm [thread:$0]  %s785_s5, 256, %s787_s28, [#allocation4], %s1177_s1, %s1177_s1, %s1178_s13  }
 0xa75   :  { %1171 = dma.done.wait [#allocation4], 256  }
 0xa76   :  { %1172 = vsyncadd [#allocation4], 4294967040 }
 0xa77   :  { %797 = vsyncpa [#allocation3], 1 }
 0xa78   :  { %798 = vsyncpa [#allocation6], 1 }
 0xa79   :  { %799 = vsyncpa [#allocation4], 1 }

</bundles_post_ra>
